<compile_context>
chip_gen: v7x
topology: tpu7x:2x2x1
jax: 0.10.0
libtpu: 0.0.40
codegen_flags: <defaults>
</compile_context>

<pallas_src>
import functools

import jax
import jax.numpy as jnp
from jax import lax
from jax.experimental import pallas as pl
from jax.experimental.pallas import tpu as pltpu

block_size = 8
n_embed = 32
vocab_size = 65  # synthetic character-level vocab size


def bigram_kernel(idx_ref, table_ref, out_ref, *, t_len):
    """idx_ref: (BTp, 1) i32; table_ref: (Vp+Tp, Vp) bf16; out_ref: (BTp, Vp) f32.

    table rows [0, Vp)        : fused bigram-logits table (tok_table @ W)
    table rows [Vp, Vp+t_len) : positional logits (pos_table[:T] @ W + b)
    """
    BTp = out_ref.shape[0]
    Vp = out_ref.shape[1]
    K = table_ref.shape[0]

    # Per-row double one-hot: 1 at column idx[r] (token row of the table) and
    # 1 at column Vp + (r % T) (positional row of the table).
    lane = lax.broadcasted_iota(jnp.int32, (BTp, K), 1)          # (BTp, K)
    row = lax.broadcasted_iota(jnp.int32, (BTp, K), 0)           # (BTp, K)
    tok_hit = lane == idx_ref[...]                               # broadcast (BTp,1)
    pos_hit = lane == (Vp + row % t_len)
    onehot = (tok_hit | pos_hit).astype(jnp.bfloat16)            # 0/1 exact in bf16

    # Single MXU matmul does the gather AND the positional add (f32 accumulate).
    out_ref[...] = jnp.dot(onehot, table_ref[...],
                           preferred_element_type=jnp.float32)   # (BTp, Vp) f32


def bigram_forward(idx, tok_table, pos_table, w_pt, b_pt):
    """Forward pass of BigramLanguageModel (targets=None).

    idx       : (B, T) int32 token ids, T <= block_size
    tok_table : (V, E) f32  token_embedding_table.weight
    pos_table : (block_size, E) f32  position_embedding_table.weight
    w_pt      : (V, E) f32  lm_head.weight (PyTorch layout)
    b_pt      : (V,)   f32  lm_head.bias
    Returns (logits (B, T, V) f32, None).
    """
    B, T = idx.shape
    V, E = tok_table.shape
    Vp = ((V + 127) // 128) * 128          # lane-dense vocab width
    Tp = 16                                # positional rows padded (bf16 sublane pack)
    BT = B * T
    BTp = ((BT + 7) // 8) * 8              # sublane-aligned row count

    # Fuse the two matmuls outside the kernel (tiny, done once by XLA).
    w = jnp.transpose(w_pt)                                    # (E, V)
    fused = tok_table @ w                                      # (V, V)
    pos_logits = pos_table[:T] @ w + b_pt[None, :]             # (T, V)

    # Stacked lookup table, zero-padded to (Vp + Tp, Vp), bf16 MXU operand.
    table = jnp.zeros((Vp + Tp, Vp), jnp.float32)
    table = table.at[:V, :V].set(fused)
    table = table.at[Vp:Vp + T, :V].set(pos_logits)
    table = table.astype(jnp.bfloat16)

    # Row-padded token ids (padded rows read row 0; their output is sliced off).
    idx2d = jnp.zeros((BTp, 1), jnp.int32).at[:BT, 0].set(
        idx.reshape(BT).astype(jnp.int32))

    vmem = pl.BlockSpec(memory_space=pltpu.MemorySpace.VMEM)
    out = pl.pallas_call(
        functools.partial(bigram_kernel, t_len=T),
        out_shape=jax.ShapeDtypeStruct((BTp, Vp), jnp.float32),
        in_specs=[vmem, vmem],
        out_specs=vmem,
    )(idx2d, table)

    logits = out[:BT, :V].reshape(B, T, V)
    # TODO(synk): cross-entropy loss path (targets != None) and generate()
    # (multinomial sampling loop) are host-side control flow, not implemented here.
    return logits, None


if __name__ == "__main__":
    key = jax.random.PRNGKey(0)
    k1, k2, k3, k4, k5 = jax.random.split(key, 5)

    B, T = 2, block_size

    # Deterministic parameter init (synthetic; shapes from the module __init__).
    tok_table = jax.random.normal(k1, (vocab_size, n_embed), jnp.float32) * 0.02
    pos_table = jax.random.normal(k2, (block_size, n_embed), jnp.float32) * 0.02
    w_pt = jax.random.normal(k3, (vocab_size, n_embed), jnp.float32) * 0.02  # (V, E)
    b_pt = jax.random.normal(k4, (vocab_size,), jnp.float32) * 0.02

    idx = jax.random.randint(k5, (B, T), 0, vocab_size, dtype=jnp.int32)

    logits, loss = bigram_forward(idx, tok_table, pos_table, w_pt, b_pt)
    logits = jax.block_until_ready(logits)

    # Pure-JAX f32 reference of the same semantics (table is bf16 in the kernel,
    # so tolerance is loosened to 1e-3).
    ref = tok_table[idx] + pos_table[:T][None, :, :]
    ref = ref @ jnp.transpose(w_pt) + b_pt
    assert logits.shape == (B, T, vocab_size)
    assert loss is None
    assert jnp.allclose(logits, ref, atol=1e-3), "kernel output mismatch vs reference"

    print("KERNEL_OK")
</pallas_src>

<mosaic_0001>
module attributes {stable_mosaic.version = 11 : i64} {
  func.func @bigram_kernel(%arg0: memref<16x1xi32, #tpu.memory_space<vmem>>, %arg1: memref<144x128xbf16, #tpu.memory_space<vmem>>, %arg2: memref<16x128xf32, #tpu.memory_space<vmem>>) attributes {dimension_semantics = [], scalar_prefetch = 0 : i64, scratch_operands = 0 : i64, tpu.core_type = #tpu.core_type<tc>} {
    %0 = tpu.iota {dimensions = array<i32: 1>} : vector<16x144xi32>
    %1 = tpu.iota {dimensions = array<i32: 0>} : vector<16x144xi32>
    %c0 = arith.constant 0 : index
    %c0_0 = arith.constant 0 : index
    %2 = vector.load %arg0[%c0, %c0_0] : memref<16x1xi32, #tpu.memory_space<vmem>>, vector<16x1xi32>
    %3 = vector.broadcast %2 : vector<16x1xi32> to vector<16x144xi32>
    %4 = arith.cmpi eq, %0, %3 : vector<16x144xi32>
    %c8_i32 = arith.constant 8 : i32
    %c0_i32 = arith.constant 0 : i32
    %5 = arith.cmpi eq, %c8_i32, %c0_i32 : i32
    %c1_i32 = arith.constant 1 : i32
    %6 = arith.select %5, %c1_i32, %c8_i32 : i32
    %7 = vector.broadcast %6 : i32 to vector<16x144xi32>
    %8 = arith.remsi %1, %7 : vector<16x144xi32>
    %c0_i32_1 = arith.constant 0 : i32
    %9 = vector.broadcast %c0_i32_1 : i32 to vector<16x144xi32>
    %10 = arith.cmpi ne, %8, %9 : vector<16x144xi32>
    %c0_i32_2 = arith.constant 0 : i32
    %11 = vector.broadcast %c0_i32_2 : i32 to vector<16x144xi32>
    %12 = arith.cmpi slt, %8, %11 : vector<16x144xi32>
    %c0_i32_3 = arith.constant 0 : i32
    %13 = arith.cmpi slt, %6, %c0_i32_3 : i32
    %14 = vector.broadcast %13 : i1 to vector<16x144xi1>
    %15 = vector.broadcast %14 : vector<16x144xi1> to vector<16x144xi1>
    %16 = arith.xori %12, %15 : vector<16x144xi1>
    %17 = arith.andi %16, %10 : vector<16x144xi1>
    %18 = vector.broadcast %6 : i32 to vector<16x144xi32>
    %19 = arith.addi %8, %18 : vector<16x144xi32>
    %20 = arith.select %17, %19, %8 : vector<16x144xi1>, vector<16x144xi32>
    %c128_i32 = arith.constant 128 : i32
    %21 = vector.broadcast %c128_i32 : i32 to vector<16x144xi32>
    %22 = arith.addi %21, %20 : vector<16x144xi32>
    %23 = arith.cmpi eq, %0, %22 : vector<16x144xi32>
    %24 = arith.ori %4, %23 : vector<16x144xi1>
    %25 = arith.extui %24 : vector<16x144xi1> to vector<16x144xi32>
    %26 = arith.sitofp %25 : vector<16x144xi32> to vector<16x144xf32>
    %27 = arith.truncf %26 : vector<16x144xf32> to vector<16x144xbf16>
    %c0_4 = arith.constant 0 : index
    %c0_5 = arith.constant 0 : index
    %28 = vector.load %arg1[%c0_4, %c0_5] : memref<144x128xbf16, #tpu.memory_space<vmem>>, vector<144x128xbf16>
    %cst = arith.constant dense<0.000000e+00> : vector<16x128xf32>
    %29 = tpu.matmul %27, %28, %cst {dimension_numbers = #tpu.dot_dimension_numbers<[1], [0], [0], [1], [0, 0, 1, 1], [], []>} : vector<16x144xbf16>, vector<144x128xbf16>, vector<16x128xf32> -> vector<16x128xf32>
    %c0_6 = arith.constant 0 : index
    %c0_7 = arith.constant 0 : index
    %30 = vector.load %arg2[%c0_6, %c0_7] : memref<16x128xf32, #tpu.memory_space<vmem>>, vector<16x128xf32>
    tpu.vector_store %arg2[%c0_6, %c0_7], %29 {strides = array<i32>} : memref<16x128xf32, #tpu.memory_space<vmem>>, vector<16x128xf32>,
    return
  }
}

</mosaic_0001>

<bundles_post_ra>
// kernel: tpu_custom_call.1
= control target key start
LH: loop header
LB: loop body
LE: loop exit
PB: predicated region body
PF: predicated region fallthrough
CT: control target
= control target key end

     0   :  { %7 = vsyncpa [#allocation3], 0  ;;  %s362_s0 = inlined_call_operand.vmem [shape: s32[16,1], index: 0, kind: input, shape index: {}]   ;;  %s363_s1 = inlined_call_operand.hbm [shape: bf16[144,128], index: 1, kind: input, shape index: {}]   ;;  %s364_s2 = inlined_call_operand.hbm [shape: f32[16,128], index: 2, kind: output, shape index: {}]  }
   0x1   :  { %8 = vsyncpa [#allocation4], 0  ;;  %s308_s9 = smov [#allocation2]   ;;  %s260_s13 = scalar_lea.hbm %s363_s1, 1152 }
   0x2   :  { %s16_s10 = sshll.u32 %s308_s9, 4  ;;  %p261_p0 = scmp.ne.s32.totalorder %s363_s1, %s260_s13  ;;  %s17_s10 = int_to_ptr.vmem [resolvable:$true] %s16_s10 }
   0x3   :  { %p264_p1 = scmp.lt.u32.totalorder %s260_s13, %s363_s1 }
   0x5   :  { %p266_p2 = pnand %p264_p1, %p261_p0 }
   0x7   :  { %269 = shalt.err (!%p266_p2)
}
   0x8   :  { %s270_s18 = scalar_lea.vmem %s17_s10, 1152  ;;  %p275_p4 = scmp.lt.s32.totalorder %s17_s10, %s17_s10 }
   0x9   :  { %p271_p3 = scmp.ne.s32.totalorder %s17_s10, %s270_s18  ;;  %p276_p5 = scmp.lt.s32.totalorder %s270_s18, %s270_s18 }
   0xb   :  { %p277_p6 = por %p276_p5, %p275_p4 }
   0xd   :  { %p278_p7 = pnand %p277_p6, %p271_p3 }
   0xf   :  { %281 = shalt.err (!%p278_p7)
}
  0x10   :  { %s309_s19 = smov 64   ;;  %s310_s20 = smov 4  }
  0x11   :  { %22 = dma.hbm_to_vmem [thread:$0]  %s363_s1, 1152, %s17_s10, [#allocation3], %s309_s19, %s309_s19, %s310_s20  }
  0x12   :  { %304 = dma.done.wait [#allocation3], 1152  }
  0x13   :  { %305 = vsyncadd [#allocation3], 4294966144  ;;  %v311_v0 = vmov 0   ;;  %v33_v1 = vld [vmem:[%s362_s0] sm:$0xff]  ;;  %v34_v3 = vld [vmem:[%s362_s0 + $0x8] sm:$0xff]  ;;  %v27_v12 = vlaneseq  ;;  %v312_v23 = vmov 0.0  }
  0x14   :  { %250 = vset.pattern.permute.xlu0 %v311_v0  ;;  %165 = vmatprep.subr.bf16.mxu0 %v311_v0  ;;  %v251_v2 = vld [vmem:[#allocation2] sm:$0xff]   ;;  %v252_v4 = vld [vmem:[#allocation2 + $0x8] sm:$0xff]   ;;  %v253_v5 = vld [vmem:[#allocation2 + $0x10] sm:$0xff]   ;;  %vm161_vm7 = vcmask 130048   ;;  %v313_v27 = vmov 1.0|1.0  }
  0x15   :  { %36 = vperm.xlu0 %250, %v33_v1   ;;  %166 = vmatpush1.bf16.msra.mxu0 %v251_v2  ;;  %v254_v6 = vld [vmem:[#allocation2 + $0x18] sm:$0xff]   ;;  %v255_v7 = vld [vmem:[#allocation2 + $0x20] sm:$0xff]   ;;  %v256_v8 = vld [vmem:[#allocation2 + $0x28] sm:$0xff]   ;;  %v31_v13 = vshrl.u32 %v27_v12, 7  ;;  %v28_v15 = vand.u32 127, %v27_v12  ;;  %s314_s0 = smov [#allocation5]  }
  0x16   :  { %167 = vmatprep.subr.bf16.mxu0 %v311_v0  ;;  %v257_v9 = vld [vmem:[#allocation2 + $0x30] sm:$0xff]   ;;  %v258_v10 = vld [vmem:[#allocation2 + $0x38] sm:$0xff]   ;;  %v259_v11 = vld [vmem:[#allocation2 + $0x40] sm:$0xff]   ;;  %s213_s1 = sshll.u32 %s314_s0, 4  ;;  %s214_s1 = int_to_ptr.vmem [resolvable:$true] %s213_s1 }
  0x17   :  { %v32_v14 = vadd.s32 8, %v31_v13  ;;  %v49_v16 = vand.u32 7, %v31_v13  ;;  %v29_v18 = vadd.s32 128, %v28_v15  ;;  %s282_s27 = scalar_lea.vmem %s214_s1, 256  ;;  %p287_p9 = scmp.lt.s32.totalorder %s214_s1, %s214_s1 }
  0x18   :  { %p283_p8 = scmp.ne.s32.totalorder %s214_s1, %s282_s27  ;;  %p288_p10 = scmp.lt.s32.totalorder %s282_s27, %s282_s27 }
  0x19   :  { %39 = vperm.xlu0 %250, %v34_v3   ;;  %168 = vmatpush1.bf16.msra.mxu0 %v252_v4  ;;  %v56_v17 = vand.u32 7, %v32_v14  ;;  %v69_v19 = vadd.s32 128, %v49_v16 }
  0x1a   :  { %169 = vmatprep.subr.bf16.mxu0 %v311_v0  ;;  %p289_p11 = por %p288_p10, %p287_p9 }
  0x1b   :  { %v70_v20 = vadd.s32 128, %v56_v17  ;;  %vm72_vm0 = vcmp.eq.s32.totalorder %v29_v18, %v69_v19 }
  0x1c   :  { %p290_p12 = pnand %p289_p11, %p283_p8 }
  0x1d   :  { %170 = vmatpush1.bf16.msra.mxu0 %v253_v5  ;;  %vm74_vm2 = vcmp.eq.s32.totalorder %v29_v18, %v70_v20 }
  0x1e   :  { %171 = vmatprep.subr.bf16.mxu0 %v311_v0 }
  0x21   :  { %172 = vmatpush1.bf16.msra.mxu0 %v254_v6 }
  0x22   :  { %173 = vmatprep.subr.bf16.mxu0 %v311_v0 }
  0x25   :  { %174 = vmatpush1.bf16.msra.mxu0 %v255_v7 }
  0x26   :  { %175 = vmatprep.subr.bf16.mxu0 %v311_v0 }
  0x29   :  { %176 = vmatpush1.bf16.msra.mxu0 %v256_v8 }
  0x2a   :  { %177 = vmatprep.subr.bf16.mxu0 %v311_v0 }
  0x2d   :  { %178 = vmatpush1.bf16.msra.mxu0 %v257_v9 }
  0x2e   :  { %179 = vmatprep.subr.bf16.mxu0 %v311_v0 }
  0x31   :  { %180 = vmatpush1.bf16.msra.mxu0 %v258_v10 }
  0x32   :  { %181 = vmatprep.subr.bf16.mxu0 %v311_v0 }
  0x35   :  { %182 = vmatpush1.bf16.msra.mxu0 %v259_v11 }
  0x94   :  { %v37_v21 = vpop.permute.xlu0 %36 }
  0x95   :  { %vm42_vm1 = vcmp.eq.s32.totalorder %v29_v18, %v37_v21  ;;  %vm41_vm8 = vcmp.eq.s32.totalorder %v28_v15, %v37_v21 }
  0x96   :  { %vm76_vm3 = vmor %vm42_vm1, %vm72_vm0 }
  0x97   :  { %v226_v24 = vsel %vm76_vm3, 1.0, %v312_v23 }
  0x98   :  { %v40_v22 = vpop.permute.xlu0 %39 }
  0x99   :  { %vm44_vm4 = vcmp.eq.s32.totalorder %v29_v18, %v40_v22  ;;  %vm43_vm6 = vcmp.eq.s32.totalorder %v28_v15, %v40_v22 }
  0x9a   :  { %vm78_vm5 = vmor %vm44_vm4, %vm74_vm2 }
  0x9b   :  { %v228_v25 = vsel %vm78_vm5, 1.0, %v312_v23  ;;  %vm239_vm9 = vmpackc.low %vm43_vm6, %vm41_vm8 }
  0x9c   :  { %v88_v26 = vpack.c.bf16 %v228_v25, %v226_v24 }
  0x9e   :  { %238 = vmatprep.mubr.msk.bf16.mxu0 %vm161_vm7, %v88_v26 }
  0x9f   :  { %240 = vmatmul.mubr.msk.bf16.vlgmr.msra.gmra.mrb[0].mxu0 %vm239_vm9, %v313_v27 }
 0x172   :  { %v199_v28 = vpop.f32.mrb[0].mxu0 }
 0x173   :  { %206 = vst [vmem:[#allocation5] sm:$0xff] %v199_v28  ;;  %v201_v29 = vpop.f32.mrb[1].mxu0 }
 0x174   :  { %v202_v30 = vpop.f32.mrb[2].mxu0 }
 0x175   :  { %207 = vst [vmem:[#allocation5 + $0x8] sm:$0xff] %v202_v30  ;;  %v204_v31 = vpop.f32.mrb[3].mxu0 }
 0x176   :  { %293 = shalt.err (!%p290_p12)
}
 0x177   :  { %s294_s30 = scalar_lea.hbm %s364_s2, 256 }
 0x178   :  { %p295_p13 = scmp.ne.s32.totalorder %s364_s2, %s294_s30  ;;  %p298_p0 = scmp.lt.u32.totalorder %s294_s30, %s364_s2 }
 0x17a   :  { %p300_p1 = pnand %p298_p0, %p295_p13 }
 0x17c   :  { %303 = shalt.err (!%p300_p1)
}
 0x17d   :  { %s315_s7 = smov 128   ;;  %s316_s8 = smov 8  }
 0x17e   :  { %219 = dma.vmem_to_hbm [thread:$0]  %s214_s1, 256, %s364_s2, [#allocation4], %s315_s7, %s315_s7, %s316_s8  }
 0x17f   :  { %306 = dma.done.wait [#allocation4], 256  }
 0x180   :  { %307 = vsyncadd [#allocation4], 4294967040 }
 0x181   :  { %223 = vsyncpa [#allocation3], 1 }
 0x182   :  { %224 = vsyncpa [#allocation4], 1 }

</bundles_post_ra>
